<compile_context>
chip_gen: v7x
topology: tpu7x:2x2x1
jax: 0.10.0
libtpu: 0.0.40
codegen_flags: <defaults>
</compile_context>

<pallas_src>
import math

import jax
import jax.numpy as jnp
from jax.experimental import pallas as pl
from jax.experimental.pallas import tpu as pltpu

NUM_HEADS = 8


def _fused_forward_kernel(x_ref, y_ref, w_att_ref, b_att_ref, w_fc_ref, b_fc_ref, o_ref):
    """out = (x @ Wf1 + bf1) @ Wc1 + (y @ Wf2 + bf2) @ Wc2 + bc  for one row tile.

    No per-head lane slicing, no exp/divide, no cross-lane reductions — the S=1
    softmax is identically 1 so attention == value path, pre-folded with out_proj.
    """
    e = x_ref.shape[-1]
    mri = (jnp.dot(x_ref[...], w_att_ref[:, :e], preferred_element_type=jnp.float32)
           + b_att_ref[:, :e])
    pet = (jnp.dot(y_ref[...], w_att_ref[:, e:], preferred_element_type=jnp.float32)
           + b_att_ref[:, e:])
    out = (jnp.dot(mri, w_fc_ref[:e, :], preferred_element_type=jnp.float32)
           + jnp.dot(pet, w_fc_ref[e:, :], preferred_element_type=jnp.float32)
           + b_fc_ref[...])
    o_ref[...] = out.astype(o_ref.dtype)


def prepare_fused_params(params):
    """One-time (init-time) constant folding of the module weights.

    PyTorch layouts:
      in_proj_weight{1,2}: (3E, E)  in_proj_bias{1,2}: (3E,)
      out_proj.weight{1,2}: (E, E)  out_proj.bias{1,2}: (E,)
      fc_out.weight: (P, 2E)        fc_out.bias: (P,)
    clinical_encoder and the Q/K rows of in_proj only feed the length-1 softmax
    (identically 1) and are therefore dropped — exact, not an approximation.
    """
    e = params["out_w1"].shape[0]

    def fold(in_w, in_b, out_w, out_b):
        wv, bv = in_w[2 * e:], in_b[2 * e:]
        w_f = wv.T @ out_w.T                      # (E, E): value proj fused with out proj
        b_f = bv @ out_w.T + out_b                # (E,)
        return w_f, b_f

    wf1, bf1 = fold(params["in_w1"], params["in_b1"], params["out_w1"], params["out_b1"])
    wf2, bf2 = fold(params["in_w2"], params["in_b2"], params["out_w2"], params["out_b2"])
    p = params["fc_w"].shape[0]
    return {
        "w_att": jnp.concatenate([wf1, wf2], axis=1),              # (E, 2E)
        "b_att": jnp.concatenate([bf1, bf2]).reshape(1, 2 * e),    # (1, 2E)
        "w_fc": params["fc_w"].T,                                  # (2E, P)
        "b_fc": params["fc_b"].reshape(1, p),                      # (1, P)
    }


def clinical_guide_forward(x, y, z, fused, *, block_rows=512):
    """Pallas forward of ClinicalGuideCrossAttention.forward -> (x, y, output)."""
    del z  # feeds only the query of a length-1 softmax: exactly no effect on output
    n, e = x.shape
    p = fused["w_fc"].shape[1]
    tm = n if n <= block_rows else block_rows     # ragged last tile handled by Pallas
    grid = (pl.cdiv(n, tm),)

    out = pl.pallas_call(
        _fused_forward_kernel,
        out_shape=jax.ShapeDtypeStruct((n, p), jnp.float32),
        grid_spec=pltpu.PrefetchScalarGridSpec(
            num_scalar_prefetch=0,
            grid=grid,
            in_specs=[
                pl.BlockSpec((tm, e), lambda i: (i, 0)),        # x row tile
                pl.BlockSpec((tm, e), lambda i: (i, 0)),        # y row tile
                pl.BlockSpec((e, 2 * e), lambda i: (0, 0)),     # fused attn weights (VMEM-resident)
                pl.BlockSpec((1, 2 * e), lambda i: (0, 0)),     # fused attn biases
                pl.BlockSpec((2 * e, p), lambda i: (0, 0)),     # fc_out weight (pre-transposed)
                pl.BlockSpec((1, p), lambda i: (0, 0)),         # fc_out bias
            ],
            out_specs=pl.BlockSpec((tm, p), lambda i: (i, 0)),
        ),
        compiler_params=pltpu.CompilerParams(
            # Shard row tiles across TensorCores (v7x has 2 TCs) and let Pallas
            # double-buffer the activation DMAs.
            dimension_semantics=("parallel",),
        ),
    )(x, y, fused["w_att"], fused["b_att"], fused["w_fc"], fused["b_fc"])
    return x, y, out


def reference(x, y, z, params):
    """Pure-JAX replica of the PyTorch forward (full Q/K/softmax path kept)."""
    e = params["out_w1"].shape[0]
    z_enc = z @ params["enc_w"].T + params["enc_b"]

    def mha(q_in, kv_in, in_w, in_b, out_w, out_b):
        d = e // NUM_HEADS
        wq, wk, wv = in_w[:e], in_w[e:2 * e], in_w[2 * e:]
        bq, bk, bv = in_b[:e], in_b[e:2 * e], in_b[2 * e:]
        q = (q_in @ wq.T + bq).reshape(-1, NUM_HEADS, d)
        k = (kv_in @ wk.T + bk).reshape(-1, NUM_HEADS, d)
        v = (kv_in @ wv.T + bv).reshape(-1, NUM_HEADS, d)
        s = jnp.sum(q * k, axis=-1, keepdims=True) / math.sqrt(d)   # (N, H, 1)
        pw = jax.nn.softmax(s, axis=-1)                             # == 1 (S = 1)
        attn = (pw * v).reshape(-1, e)
        return attn @ out_w.T + out_b

    mri = mha(z_enc, x, params["in_w1"], params["in_b1"], params["out_w1"], params["out_b1"])
    pet = mha(z_enc, y, params["in_w2"], params["in_b2"], params["out_w2"], params["out_b2"])
    out = jnp.concatenate([mri, pet], axis=1) @ params["fc_w"].T + params["fc_b"]
    return x, y, out


if __name__ == "__main__":
    E = 128          # input_dim / feature_size (divisible by 8 heads, lane-dense)
    N = 16           # batch rows (PyTorch seq dim before unsqueeze)
    P = 2            # output_dim
    CLIN = 4         # clinical feature dim

    key = jax.random.PRNGKey(0)
    keys = jax.random.split(key, 16)
    x = jax.random.normal(keys[0], (N, E), jnp.float32)
    y = jax.random.normal(keys[1], (N, E), jnp.float32)
    z = jax.random.normal(keys[2], (N, CLIN), jnp.float32)

    def u(k, shape, fan):
        b = math.sqrt(1.0 / fan)
        return jax.random.uniform(k, shape, jnp.float32, -b, b)

    # Deterministic synthetic parameters in PyTorch layouts.
    params = {
        "enc_w": u(keys[3], (E, CLIN), CLIN), "enc_b": u(keys[4], (E,), CLIN),
        "in_w1": u(keys[5], (3 * E, E), E),   "in_b1": u(keys[6], (3 * E,), E),
        "out_w1": u(keys[7], (E, E), E),      "out_b1": u(keys[8], (E,), E),
        "in_w2": u(keys[9], (3 * E, E), E),   "in_b2": u(keys[10], (3 * E,), E),
        "out_w2": u(keys[11], (E, E), E),     "out_b2": u(keys[12], (E,), E),
        "fc_w": u(keys[13], (P, 2 * E), 2 * E), "fc_b": u(keys[14], (P,), 2 * E),
    }

    fused = prepare_fused_params(params)        # hoisted out of the per-call path
    fwd = jax.jit(clinical_guide_forward)

    rx, ry, out = fwd(x, y, z, fused)
    jax.block_until_ready(out)

    _, _, ref_out = reference(x, y, z, params)
    assert out.shape == (N, P)
    assert bool(jnp.array_equal(rx, x)) and bool(jnp.array_equal(ry, y))
    assert jnp.allclose(out, ref_out, atol=1e-4, rtol=1e-4), "mismatch vs reference"
    print("KERNEL_OK")
</pallas_src>

<mosaic_0001>
module attributes {stable_mosaic.version = 11 : i64} {
  func.func @_fused_forward_kernel(%arg0: i32, %arg1: memref<16x128xf32, #tpu.memory_space<vmem>>, %arg2: memref<16x128xf32, #tpu.memory_space<vmem>>, %arg3: memref<128x256xf32, #tpu.memory_space<vmem>>, %arg4: memref<1x256xf32, #tpu.memory_space<vmem>>, %arg5: memref<256x2xf32, #tpu.memory_space<vmem>>, %arg6: memref<1x2xf32, #tpu.memory_space<vmem>>, %arg7: memref<16x2xf32, #tpu.memory_space<vmem>>) attributes {dimension_semantics = [#tpu.dimension_semantics<parallel>], iteration_bounds = array<i64: 1>, scalar_prefetch = 0 : i64, scratch_operands = 0 : i64, tpu.core_type = #tpu.core_type<tc>, window_params = [{transform_indices = @transform_0, window_bounds = array<i64: 16, 128>}, {transform_indices = @transform_1, window_bounds = array<i64: 16, 128>}, {pipeline_mode = #tpu.pipeline_mode<synchronous>, transform_indices = @transform_2, window_bounds = array<i64: 128, 256>}, {pipeline_mode = #tpu.pipeline_mode<synchronous>, transform_indices = @transform_3, window_bounds = array<i64: 1, 256>}, {pipeline_mode = #tpu.pipeline_mode<synchronous>, transform_indices = @transform_4, window_bounds = array<i64: 256, 2>}, {pipeline_mode = #tpu.pipeline_mode<synchronous>, transform_indices = @transform_5, window_bounds = array<i64: 1, 2>}, {transform_indices = @transform_6, window_bounds = array<i64: 16, 2>}]} {
    %c0 = arith.constant 0 : index
    %c0_0 = arith.constant 0 : index
    %0 = vector.load %arg1[%c0, %c0_0] : memref<16x128xf32, #tpu.memory_space<vmem>>, vector<16x128xf32>
    %c0_1 = arith.constant 0 : index
    %c0_2 = arith.constant 0 : index
    %1 = vector.load %arg3[%c0_1, %c0_2] : memref<128x256xf32, #tpu.memory_space<vmem>>, vector<128x128xf32>
    %cst = arith.constant dense<0.000000e+00> : vector<16x128xf32>
    %2 = tpu.matmul %0, %1, %cst {dimension_numbers = #tpu.dot_dimension_numbers<[1], [0], [0], [1], [0, 0, 1, 1], [], []>} : vector<16x128xf32>, vector<128x128xf32>, vector<16x128xf32> -> vector<16x128xf32>
    %c0_3 = arith.constant 0 : index
    %c0_4 = arith.constant 0 : index
    %3 = vector.load %arg4[%c0_3, %c0_4] : memref<1x256xf32, #tpu.memory_space<vmem>>, vector<1x128xf32>
    %4 = vector.broadcast %3 : vector<1x128xf32> to vector<16x128xf32>
    %5 = arith.addf %2, %4 : vector<16x128xf32>
    %c0_5 = arith.constant 0 : index
    %c0_6 = arith.constant 0 : index
    %6 = vector.load %arg2[%c0_5, %c0_6] : memref<16x128xf32, #tpu.memory_space<vmem>>, vector<16x128xf32>
    %c0_7 = arith.constant 0 : index
    %c128 = arith.constant 128 : index
    %7 = vector.load %arg3[%c0_7, %c128] : memref<128x256xf32, #tpu.memory_space<vmem>>, vector<128x128xf32>
    %cst_8 = arith.constant dense<0.000000e+00> : vector<16x128xf32>
    %8 = tpu.matmul %6, %7, %cst_8 {dimension_numbers = #tpu.dot_dimension_numbers<[1], [0], [0], [1], [0, 0, 1, 1], [], []>} : vector<16x128xf32>, vector<128x128xf32>, vector<16x128xf32> -> vector<16x128xf32>
    %c0_9 = arith.constant 0 : index
    %c128_10 = arith.constant 128 : index
    %9 = vector.load %arg4[%c0_9, %c128_10] : memref<1x256xf32, #tpu.memory_space<vmem>>, vector<1x128xf32>
    %10 = vector.broadcast %9 : vector<1x128xf32> to vector<16x128xf32>
    %11 = arith.addf %8, %10 : vector<16x128xf32>
    %c0_11 = arith.constant 0 : index
    %c0_12 = arith.constant 0 : index
    %12 = vector.load %arg5[%c0_11, %c0_12] : memref<256x2xf32, #tpu.memory_space<vmem>>, vector<128x2xf32>
    %cst_13 = arith.constant dense<0.000000e+00> : vector<16x2xf32>
    %13 = tpu.matmul %5, %12, %cst_13 {dimension_numbers = #tpu.dot_dimension_numbers<[1], [0], [0], [1], [0, 0, 1, 1], [], []>} : vector<16x128xf32>, vector<128x2xf32>, vector<16x2xf32> -> vector<16x2xf32>
    %c128_14 = arith.constant 128 : index
    %c0_15 = arith.constant 0 : index
    %14 = vector.load %arg5[%c128_14, %c0_15] : memref<256x2xf32, #tpu.memory_space<vmem>>, vector<128x2xf32>
    %cst_16 = arith.constant dense<0.000000e+00> : vector<16x2xf32>
    %15 = tpu.matmul %11, %14, %cst_16 {dimension_numbers = #tpu.dot_dimension_numbers<[1], [0], [0], [1], [0, 0, 1, 1], [], []>} : vector<16x128xf32>, vector<128x2xf32>, vector<16x2xf32> -> vector<16x2xf32>
    %16 = arith.addf %13, %15 : vector<16x2xf32>
    %c0_17 = arith.constant 0 : index
    %c0_18 = arith.constant 0 : index
    %17 = vector.load %arg6[%c0_17, %c0_18] : memref<1x2xf32, #tpu.memory_space<vmem>>, vector<1x2xf32>
    %18 = vector.broadcast %17 : vector<1x2xf32> to vector<16x2xf32>
    %19 = arith.addf %16, %18 : vector<16x2xf32>
    %c0_19 = arith.constant 0 : index
    %c0_20 = arith.constant 0 : index
    %20 = vector.load %arg7[%c0_19, %c0_20] : memref<16x2xf32, #tpu.memory_space<vmem>>, vector<16x2xf32>
    tpu.vector_store %arg7[%c0_19, %c0_20], %19 {strides = array<i32>} : memref<16x2xf32, #tpu.memory_space<vmem>>, vector<16x2xf32>,
    return
  }
  func.func @transform_0(%arg0: i32) -> (i32, i32) {
    %c0_i32 = arith.constant 0 : i32
    %c0_i32_0 = arith.constant 0 : i32
    return %arg0, %c0_i32 : i32, i32
  }
  func.func @transform_1(%arg0: i32) -> (i32, i32) {
    %c0_i32 = arith.constant 0 : i32
    %c0_i32_0 = arith.constant 0 : i32
    return %arg0, %c0_i32 : i32, i32
  }
  func.func @transform_2(%arg0: i32) -> (i32, i32) {
    %c0_i32 = arith.constant 0 : i32
    %c0_i32_0 = arith.constant 0 : i32
    %c0_i32_1 = arith.constant 0 : i32
    return %c0_i32, %c0_i32_0 : i32, i32
  }
  func.func @transform_3(%arg0: i32) -> (i32, i32) {
    %c0_i32 = arith.constant 0 : i32
    %c0_i32_0 = arith.constant 0 : i32
    %c0_i32_1 = arith.constant 0 : i32
    return %c0_i32, %c0_i32_0 : i32, i32
  }
  func.func @transform_4(%arg0: i32) -> (i32, i32) {
    %c0_i32 = arith.constant 0 : i32
    %c0_i32_0 = arith.constant 0 : i32
    %c0_i32_1 = arith.constant 0 : i32
    return %c0_i32, %c0_i32_0 : i32, i32
  }
  func.func @transform_5(%arg0: i32) -> (i32, i32) {
    %c0_i32 = arith.constant 0 : i32
    %c0_i32_0 = arith.constant 0 : i32
    %c0_i32_1 = arith.constant 0 : i32
    return %c0_i32, %c0_i32_0 : i32, i32
  }
  func.func @transform_6(%arg0: i32) -> (i32, i32) {
    %c0_i32 = arith.constant 0 : i32
    %c0_i32_0 = arith.constant 0 : i32
    return %arg0, %c0_i32 : i32, i32
  }
}

</mosaic_0001>

<bundles_post_ra>
// kernel: clinical_guide_forward.1
= control target key start
LH: loop header
LB: loop body
LE: loop exit
PB: predicated region body
PF: predicated region fallthrough
CT: control target
= control target key end

     0   :  { %11 = vsyncpa [#allocation3], 0  ;;  %s1118_s0 = inlined_call_operand.hbm [shape: f32[16,128], index: 0, kind: input, shape index: {}]   ;;  %s1119_s1 = inlined_call_operand.hbm [shape: f32[16,128], index: 1, kind: input, shape index: {}]   ;;  %s1120_s2 = inlined_call_operand.vmem [shape: f32[128,256], index: 2, kind: input, shape index: {}]   ;;  %s1121_s3 = inlined_call_operand.vmem [shape: f32[1,256], index: 3, kind: input, shape index: {}]   ;;  %s1122_s4 = inlined_call_operand.vmem [shape: f32[256,2], index: 4, kind: input, shape index: {}]   ;;  %s1123_s5 = inlined_call_operand.vmem [shape: f32[1,2], index: 5, kind: input, shape index: {}]   ;;  %s1124_s6 = inlined_call_operand.vmem [shape: f32[16,2], index: 6, kind: output, shape index: {}]  }
   0x1   :  { %12 = vsyncpa [#allocation5], 0  ;;  %s848_s21 = smov [#allocation2]   ;;  %s800_s25 = scalar_lea.hbm %s1118_s0, 256 }
   0x2   :  { %s18_s22 = sshll.u32 %s848_s21, 4  ;;  %p801_p0 = scmp.ne.s32.totalorder %s1118_s0, %s800_s25  ;;  %s19_s22 = int_to_ptr.vmem [resolvable:$true] %s18_s22 }
   0x3   :  { %p804_p1 = scmp.lt.u32.totalorder %s800_s25, %s1118_s0 }
   0x5   :  { %p806_p2 = pnand %p804_p1, %p801_p0 }
   0x7   :  { %809 = shalt.err (!%p806_p2)
}
   0x8   :  { %s810_s30 = scalar_lea.vmem %s19_s22, 256  ;;  %p815_p4 = scmp.lt.s32.totalorder %s19_s22, %s19_s22 }
   0x9   :  { %p811_p3 = scmp.ne.s32.totalorder %s19_s22, %s810_s30  ;;  %p816_p5 = scmp.lt.s32.totalorder %s810_s30, %s810_s30 }
   0xb   :  { %p817_p6 = por %p816_p5, %p815_p4 }
   0xd   :  { %p818_p7 = pnand %p817_p6, %p811_p3 }
   0xf   :  { %821 = shalt.err (!%p818_p7)
}
  0x10   :  { %s849_s7 = smov 128   ;;  %s850_s8 = smov 8  }
  0x11   :  { %24 = dma.hbm_to_vmem [thread:$0]  %s1118_s0, 256, %s19_s22, [#allocation3], %s849_s7, %s849_s7, %s850_s8  }
  0x12   :  { %s851_s11 = smov [#allocation4]   ;;  %s822_s15 = scalar_lea.hbm %s1119_s1, 256 }
  0x13   :  { %s30_s12 = sshll.u32 %s851_s11, 4  ;;  %p823_p8 = scmp.ne.s32.totalorder %s1119_s1, %s822_s15  ;;  %s31_s12 = int_to_ptr.vmem [resolvable:$true] %s30_s12 }
  0x14   :  { %p826_p9 = scmp.lt.u32.totalorder %s822_s15, %s1119_s1 }
  0x16   :  { %p828_p10 = pnand %p826_p9, %p823_p8 }
  0x18   :  { %831 = shalt.err (!%p828_p10)
}
  0x19   :  { %s832_s20 = scalar_lea.vmem %s31_s12, 256  ;;  %p837_p12 = scmp.lt.s32.totalorder %s31_s12, %s31_s12 }
  0x1a   :  { %p833_p11 = scmp.ne.s32.totalorder %s31_s12, %s832_s20  ;;  %p838_p13 = scmp.lt.s32.totalorder %s832_s20, %s832_s20 }
  0x1c   :  { %p839_p0 = por %p838_p13, %p837_p12 }
  0x1e   :  { %p840_p1 = pnand %p839_p0, %p833_p11 }
  0x20   :  { %843 = shalt.err (!%p840_p1)
}
  0x21   :  { %36 = dma.hbm_to_vmem [thread:$0]  %s1119_s1, 256, %s31_s12, [#allocation5], %s849_s7, %s849_s7, %s850_s8  }
  0x22   :  { %844 = dma.done.wait [#allocation3], 256  }
  0x23   :  { %845 = vsyncadd [#allocation3], 4294967040 }
  0x24   :  { %846 = dma.done.wait [#allocation5], 256  }
  0x25   :  { %847 = vsyncadd [#allocation5], 4294967040  ;;  %v53_v0 = vld [vmem:[%s1120_s2] sm:$0xff]  ;;  %v54_v1 = vld [vmem:[%s1120_s2 + $0x10] sm:$0xff]  ;;  %vm442_vm0 = vcmask 15360  }
  0x26   :  { %v55_v2 = vld [vmem:[%s1120_s2 + $0x20] sm:$0xff]  ;;  %v666_v3 = vpack.c.bf16 %v54_v1, %v53_v0  ;;  %v56_v4 = vld [vmem:[%s1120_s2 + $0x30] sm:$0xff]  ;;  %v153_v25 = vld [vmem:[%s1120_s2 + $0x8] sm:$0xff] }
  0x27   :  { %v670_v5 = vpack.c.bf16 %v56_v4, %v55_v2  ;;  %v57_v6 = vld [vmem:[%s1120_s2 + $0x40] sm:$0xff]  ;;  %v58_v7 = vld [vmem:[%s1120_s2 + $0x50] sm:$0xff]  ;;  %v154_v26 = vld [vmem:[%s1120_s2 + $0x18] sm:$0xff] }
  0x28   :  { %667 = vmatprep.subr.bf16.mxu1 %v666_v3  ;;  %v674_v8 = vpack.c.bf16 %v58_v7, %v57_v6  ;;  %v51_v9 = vld [vmem:[#allocation2] sm:$0xff]  ;;  %v60_v11 = vld [vmem:[%s1120_s2 + $0x70] sm:$0xff]  ;;  %v698_v27 = vpack.c.bf16 %v154_v26, %v153_v25  ;;  %v155_v28 = vld [vmem:[%s1120_s2 + $0x28] sm:$0xff] }
  0x29   :  { %669 = vmatpush3.bf16.msra.mxu1 %v666_v3  ;;  %v59_v10 = vld [vmem:[%s1120_s2 + $0x60] sm:$0xff]  ;;  %558 = vmatprep.mubr.f32.mxu1 %v51_v9  ;;  %v62_v14 = vld [vmem:[%s1120_s2 + $0x90] sm:$0xff]  ;;  %v156_v29 = vld [vmem:[%s1120_s2 + $0x38] sm:$0xff] }
  0x2a   :  { %671 = vmatprep.subr.bf16.mxu1 %v670_v5  ;;  %v678_v12 = vpack.c.bf16 %v60_v11, %v59_v10  ;;  %v61_v13 = vld [vmem:[%s1120_s2 + $0x80] sm:$0xff]  ;;  %v64_v17 = vld [vmem:[%s1120_s2 + $0xb0] sm:$0xff]  ;;  %v52_v30 = vld [vmem:[#allocation2 + $0x8] sm:$0xff]  ;;  %v702_v31 = vpack.c.bf16 %v156_v29, %v155_v28 }
  0x2b   :  { %v682_v15 = vpack.c.bf16 %v62_v14, %v61_v13  ;;  %v63_v16 = vld [vmem:[%s1120_s2 + $0xa0] sm:$0xff]  ;;  %v66_v20 = vld [vmem:[%s1120_s2 + $0xd0] sm:$0xff]  ;;  %v157_v33 = vld [vmem:[%s1120_s2 + $0x48] sm:$0xff] }
  0x2c   :  { %v686_v18 = vpack.c.bf16 %v64_v17, %v63_v16  ;;  %v65_v19 = vld [vmem:[%s1120_s2 + $0xc0] sm:$0xff]  ;;  %v68_v23 = vld [vmem:[%s1120_s2 + $0xf0] sm:$0xff]  ;;  %v158_v34 = vld [vmem:[%s1120_s2 + $0x58] sm:$0xff] }
  0x2d   :  { %673 = vmatpush3.bf16.msra.mxu1 %v670_v5  ;;  %v690_v21 = vpack.c.bf16 %v66_v20, %v65_v19  ;;  %v67_v22 = vld [vmem:[%s1120_s2 + $0xe0] sm:$0xff]  ;;  %v151_v32 = vld [vmem:[#allocation4] sm:$0xff]  ;;  %v706_v35 = vpack.c.bf16 %v158_v34, %v157_v33  ;;  %v159_v36 = vld [vmem:[%s1120_s2 + $0x68] sm:$0xff] }
  0x2e   :  { %675 = vmatprep.subr.bf16.mxu1 %v674_v8  ;;  %v694_v24 = vpack.c.bf16 %v68_v23, %v67_v22  ;;  %v160_v37 = vld [vmem:[%s1120_s2 + $0x78] sm:$0xff]  ;;  %v161_v39 = vld [vmem:[%s1120_s2 + $0x88] sm:$0xff]  ;;  %v267_v52 = vld [vmem:[%s1122_s4 + $0x80] sm:$0xff] }
  0x2f   :  { %v710_v38 = vpack.c.bf16 %v160_v37, %v159_v36  ;;  %v162_v40 = vld [vmem:[%s1120_s2 + $0x98] sm:$0xff]  ;;  %v163_v42 = vld [vmem:[%s1120_s2 + $0xa8] sm:$0xff]  ;;  %v269_v55 = vld [vmem:[%s1122_s4 + $0x90] sm:$0xff] }
  0x30   :  { %v714_v41 = vpack.c.bf16 %v162_v40, %v161_v39  ;;  %v164_v43 = vld [vmem:[%s1120_s2 + $0xb8] sm:$0xff]  ;;  %v165_v45 = vld [vmem:[%s1120_s2 + $0xc8] sm:$0xff]  ;;  %v271_v58 = vld [vmem:[%s1122_s4 + $0xa0] sm:$0xff] }
  0x31   :  { %677 = vmatpush3.bf16.msra.mxu1 %v674_v8  ;;  %v718_v44 = vpack.c.bf16 %v164_v43, %v163_v42  ;;  %v166_v46 = vld [vmem:[%s1120_s2 + $0xd8] sm:$0xff]  ;;  %v167_v48 = vld [vmem:[%s1120_s2 + $0xe8] sm:$0xff]  ;;  %v273_v61 = vld [vmem:[%s1122_s4 + $0xb0] sm:$0xff] }
  0x32   :  { %679 = vmatprep.subr.bf16.mxu1 %v678_v12  ;;  %v722_v47 = vpack.c.bf16 %v166_v46, %v165_v45  ;;  %v168_v49 = vld [vmem:[%s1120_s2 + $0xf8] sm:$0xff]  ;;  %v268_v53 = vld [vmem:[%s1122_s4 + $0x88] sm:$0xff]  ;;  %v275_v0 = vld [vmem:[%s1122_s4 + $0xc0] sm:$0xff] }
  0x33   :  { %v726_v50 = vpack.c.bf16 %v168_v49, %v167_v48  ;;  %v152_v51 = vld [vmem:[#allocation4 + $0x8] sm:$0xff]  ;;  %v730_v54 = vpack.c.bf16 %v268_v53, %v267_v52  ;;  %v272_v59 = vld [vmem:[%s1122_s4 + $0xa8] sm:$0xff]  ;;  %v277_v3 = vld [vmem:[%s1122_s4 + $0xd0] sm:$0xff] }
  0x34   :  { %v270_v56 = vld [vmem:[%s1122_s4 + $0x98] sm:$0xff]  ;;  %v738_v60 = vpack.c.bf16 %v272_v59, %v271_v58  ;;  %v276_v1 = vld [vmem:[%s1122_s4 + $0xc8] sm:$0xff]  ;;  %v279_v6 = vld [vmem:[%s1122_s4 + $0xe0] sm:$0xff] }
  0x35   :  { %681 = vmatpush3.bf16.msra.mxu1 %v678_v12  ;;  %v734_v57 = vpack.c.bf16 %v270_v56, %v269_v55  ;;  %731 = vmatprep.subr.bf16.mxu0 %v730_v54  ;;  %v274_v62 = vld [vmem:[%s1122_s4 + $0xb8] sm:$0xff]  ;;  %v746_v2 = vpack.c.bf16 %v276_v1, %v275_v0  ;;  %v280_v7 = vld [vmem:[%s1122_s4 + $0xe8] sm:$0xff]  ;;  %v281_v9 = vld [vmem:[%s1122_s4 + $0xf0] sm:$0xff] }
  0x36   :  { %683 = vmatprep.subr.bf16.mxu1 %v682_v15  ;;  %733 = vmatpush3.bf16.msra.mxu0 %v730_v54  ;;  %v742_v63 = vpack.c.bf16 %v274_v62, %v273_v61  ;;  %v278_v4 = vld [vmem:[%s1122_s4 + $0xd8] sm:$0xff]  ;;  %v754_v8 = vpack.c.bf16 %v280_v7, %v279_v6  ;;  %v251_v12 = vld [vmem:[%s1122_s4] sm:$0xff]  ;;  %v252_v13 = vld [vmem:[%s1122_s4 + $0x8] sm:$0xff] }
  0x37   :  { %735 = vmatprep.subr.bf16.mxu0 %v734_v57  ;;  %v750_v5 = vpack.c.bf16 %v278_v4, %v277_v3  ;;  %v282_v10 = vld [vmem:[%s1122_s4 + $0xf8] sm:$0xff]  ;;  %v762_v14 = vpack.c.bf16 %v252_v13, %v251_v12  ;;  %v452_v17 = vld [vmem:[%s1121_s3 + $0x1] ss:$0 sm:$0xff]  ;;  %v253_v19 = vld [vmem:[%s1122_s4 + $0x10] sm:$0xff] }
  0x38   :  { %v758_v11 = vpack.c.bf16 %v282_v10, %v281_v9  ;;  %v254_v20 = vld [vmem:[%s1122_s4 + $0x18] sm:$0xff]  ;;  %v256_v28 = vld [vmem:[%s1122_s4 + $0x28] sm:$0xff]  ;;  %v259_v33 = vld [vmem:[%s1122_s4 + $0x40] sm:$0xff] }
  0x39   :  { %685 = vmatpush3.bf16.msra.mxu1 %v682_v15  ;;  %v766_v25 = vpack.c.bf16 %v254_v20, %v253_v19  ;;  %v260_v34 = vld [vmem:[%s1122_s4 + $0x48] sm:$0xff]  ;;  %v261_v36 = vld [vmem:[%s1122_s4 + $0x50] sm:$0xff]  ;;  %v262_v37 = vld [vmem:[%s1122_s4 + $0x58] sm:$0xff] }
  0x3a   :  { %687 = vmatprep.subr.bf16.mxu1 %v686_v18  ;;  %737 = vmatpush3.bf16.msra.mxu0 %v734_v57  ;;  %v263_v39 = vld [vmem:[%s1122_s4 + $0x60] sm:$0xff]  ;;  %v264_v40 = vld [vmem:[%s1122_s4 + $0x68] sm:$0xff]  ;;  %v265_v42 = vld [vmem:[%s1122_s4 + $0x70] sm:$0xff] }
  0x3b   :  { %739 = vmatprep.subr.bf16.mxu0 %v738_v60  ;;  %v266_v43 = vld [vmem:[%s1122_s4 + $0x78] sm:$0xff]  ;;  %v453_v46 = vld [vmem:[%s1123_s5] ss:$0 sm:$0xff] }
  0x3d   :  { %689 = vmatpush3.bf16.msra.mxu1 %v686_v18 }
  0x3e   :  { %691 = vmatprep.subr.bf16.mxu1 %v690_v21  ;;  %741 = vmatpush3.bf16.msra.mxu0 %v738_v60 }
  0x3f   :  { %743 = vmatprep.subr.bf16.mxu0 %v742_v63 }
  0x41   :  { %693 = vmatpush3.bf16.msra.mxu1 %v690_v21  ;;  %v451_v21 = vld [vmem:[%s1121_s3] ss:$0 sm:$0xff] }
  0x42   :  { %695 = vmatprep.subr.bf16.mxu1 %v694_v24  ;;  %745 = vmatpush3.bf16.msra.mxu0 %v742_v63 }
  0x43   :  { %747 = vmatprep.subr.bf16.mxu0 %v746_v2 }
  0x45   :  { %697 = vmatpush3.bf16.msra.mxu1 %v694_v24 }
  0x46   :  { %699 = vmatprep.subr.bf16.mxu1 %v698_v27  ;;  %749 = vmatpush3.bf16.msra.mxu0 %v746_v2 }
  0x47   :  { %751 = vmatprep.subr.bf16.mxu0 %v750_v5 }
  0x48   :  { %559 = vmatmul.mubr.f32.vlgmr.msra.gmra.mrb[0].mxu1 %v52_v30  ;;  %v257_v30 = vld [vmem:[%s1122_s4 + $0x30] sm:$0xff] }
  0x49   :  { %701 = vmatpush3.bf16.msra.mxu1 %v698_v27  ;;  %593 = vmatprep.mubr.f32.mxu1 %v151_v32  ;;  %v255_v27 = vld [vmem:[%s1122_s4 + $0x20] sm:$0xff] }
  0x4a   :  { %703 = vmatprep.subr.bf16.mxu1 %v702_v31  ;;  %753 = vmatpush3.bf16.msra.mxu0 %v750_v5  ;;  %v770_v29 = vpack.c.bf16 %v256_v28, %v255_v27 }
  0x4b   :  { %755 = vmatprep.subr.bf16.mxu0 %v754_v8 }
  0x4d   :  { %705 = vmatpush3.bf16.msra.mxu1 %v702_v31  ;;  %v258_v31 = vld [vmem:[%s1122_s4 + $0x38] sm:$0xff] }
  0x4e   :  { %707 = vmatprep.subr.bf16.mxu1 %v706_v35  ;;  %757 = vmatpush3.bf16.msra.mxu0 %v754_v8  ;;  %v774_v32 = vpack.c.bf16 %v258_v31, %v257_v30 }
  0x4f   :  { %759 = vmatprep.subr.bf16.mxu0 %v758_v11 }
  0x51   :  { %709 = vmatpush3.bf16.msra.mxu1 %v706_v35  ;;  %v778_v35 = vpack.c.bf16 %v260_v34, %v259_v33 }
  0x52   :  { %711 = vmatprep.subr.bf16.mxu1 %v710_v38  ;;  %761 = vmatpush3.bf16.msra.mxu0 %v758_v11 }
  0x53   :  { %763 = vmatprep.subr.bf16.mxu0 %v762_v14 }
  0x55   :  { %713 = vmatpush3.bf16.msra.mxu1 %v710_v38  ;;  %v782_v38 = vpack.c.bf16 %v262_v37, %v261_v36 }
  0x56   :  { %715 = vmatprep.subr.bf16.mxu1 %v714_v41 }
  0x59   :  { %717 = vmatpush3.bf16.msra.mxu1 %v714_v41  ;;  %v786_v41 = vpack.c.bf16 %v264_v40, %v263_v39 }
  0x5a   :  { %719 = vmatprep.subr.bf16.mxu1 %v718_v44 }
  0x5d   :  { %721 = vmatpush3.bf16.msra.mxu1 %v718_v44  ;;  %v790_v44 = vpack.c.bf16 %v266_v43, %v265_v42 }
  0x5e   :  { %723 = vmatprep.subr.bf16.mxu1 %v722_v47 }
  0x61   :  { %725 = vmatpush3.bf16.msra.mxu1 %v722_v47 }
  0x62   :  { %727 = vmatprep.subr.bf16.mxu1 %v726_v50 }
  0x65   :  { %729 = vmatpush3.bf16.msra.mxu1 %v726_v50 }
  0x68   :  { %594 = vmatmul.mubr.f32.vlgmr.msra.gmra.mrb[2].mxu1 %v152_v51 }
 0x11b   :  { %v560_v15 = vpop.f32.mrb[0].mxu1 }
 0x11c   :  { %v142_v16 = vpop.f32.mrb[1].mxu1  ;;  %v148_v45 = vadd.f32 %v560_v15, %v451_v21 }
 0x11d   :  { %v143_v26 = vadd.f32 %v451_v21, %v142_v16 }
 0x13b   :  { %v595_v18 = vpop.f32.mrb[2].mxu1 }
 0x13c   :  { %v242_v22 = vpop.f32.mrb[3].mxu1  ;;  %v248_v24 = vadd.f32 %v595_v18, %v452_v17 }
 0x13d   :  { %v243_v23 = vadd.f32 %v452_v17, %v242_v22 }
 0x13f   :  { %628 = vmatprep.mubr.f32.mxu0 %v243_v23 }
 0x140   :  { %629 = vmatmul.mubr.f32.vlgmr.msra.gmra.mrb[0].mxu0 %v248_v24 }
 0x141   :  { %765 = vmatpush3.bf16.msra.mxu0 %v762_v14  ;;  %663 = vmatprep.mubr.f32.mxu0 %v143_v26 }
 0x142   :  { %767 = vmatprep.subr.bf16.mxu0 %v766_v25 }
 0x145   :  { %769 = vmatpush3.bf16.msra.mxu0 %v766_v25 }
 0x146   :  { %771 = vmatprep.subr.bf16.mxu0 %v770_v29 }
 0x149   :  { %773 = vmatpush3.bf16.msra.mxu0 %v770_v29 }
 0x14a   :  { %775 = vmatprep.subr.bf16.mxu0 %v774_v32 }
 0x14d   :  { %777 = vmatpush3.bf16.msra.mxu0 %v774_v32 }
 0x14e   :  { %779 = vmatprep.subr.bf16.mxu0 %v778_v35 }
 0x151   :  { %781 = vmatpush3.bf16.msra.mxu0 %v778_v35 }
 0x152   :  { %783 = vmatprep.subr.bf16.mxu0 %v782_v38 }
 0x155   :  { %785 = vmatpush3.bf16.msra.mxu0 %v782_v38 }
 0x156   :  { %787 = vmatprep.subr.bf16.mxu0 %v786_v41 }
 0x159   :  { %789 = vmatpush3.bf16.msra.mxu0 %v786_v41 }
 0x15a   :  { %791 = vmatprep.subr.bf16.mxu0 %v790_v44 }
 0x15d   :  { %793 = vmatpush3.bf16.msra.mxu0 %v790_v44 }
 0x160   :  { %664 = vmatmul.mubr.f32.vlgmr.msra.gmra.mrb[0].mxu0 %v148_v45 }
 0x233   :  { %v665_v47 = vpop.f32.mrb[0].mxu0 }
 0x234   :  { %v441_v48 = vadd.f32 %v665_v47, %v453_v46  ;;  %v424_v49 = vpop.f32.mrb[1].mxu0 }
 0x235   :  { %v440_v50 = vadd.f32 %v453_v46, %v424_v49 }
 0x236   :  { %444 = vst.msk [vmem:[%s1124_s6 + $0x8] sm:$0xff] %vm442_vm0, %v441_v48 }
 0x237   :  { %443 = vst.msk [vmem:[%s1124_s6] sm:$0xff] %vm442_vm0, %v440_v50 }
 0x238   :  { %449 = vsyncpa [#allocation3], 1 }
 0x239   :  { %450 = vsyncpa [#allocation5], 1 }

</bundles_post_ra>
